<compile_context>
chip_gen: v6e
topology: v6e:2x2x1
jax: 0.10.0
libtpu: 0.0.40
codegen_flags: <defaults>
</compile_context>

<pallas_src>
import math

import jax
import jax.numpy as jnp
from jax import lax
from jax.experimental import pallas as pl
from jax.experimental.pallas import tpu as pltpu


_NUM_CORE_SPLITS = 2                      # leading "parallel" axis -> both TCs on v7x
_BIG_VMEM_BYTES = 96 * 1024 * 1024        # v5e / v6e have 128 MiB physical VMEM
_IMG_TILE_BYTES_BIG = 8 * 1024 * 1024     # per-image-block budget on big-VMEM chips
_IMG_TILE_BYTES_SMALL = 4 * 1024 * 1024   # per-image-block budget on v7x (64 MiB VMEM)
_PT_TILE_BYTES = 1 * 1024 * 1024          # per point-cloud array block budget


def _cdiv(a, b):
    return -(-a // b)


def _sublane(dtype):
    """Sublane tile multiple for a dtype (f32:8, bf16:16, int8/fp8:32)."""
    return {4: 8, 2: 16, 1: 32}.get(jnp.dtype(dtype).itemsize, 8)


def _vmem_capacity_bytes():
    try:
        info = pltpu.get_tpu_info()
        for attr in ("vmem_capacity_bytes", "vmem_size_bytes", "vmem_bytes"):
            v = getattr(info, attr, None)
            if v:
                return int(v)
    except Exception:
        pass
    return 64 * 1024 * 1024  # conservative default (v7x per-TC VMEM)


def _make_kernel(*, img_rows, tile_rows, img_w, n_img_tiles, tiles_per_core,
                 n_pts, n_feat, tile_pts, n_pt_tiles, n_inner,
                 inv_n_img, inv_n_pts, inv_tv, w_img, w_kl, w_tv):
    """Builds the kernel with all shapes / normalizers / weights baked in as constants."""

    def kernel(pred_ref, gt_ref, mu_ref, logvar_ref, feat_ref, out_ref,
               acc_img, acc_kl, acc_tv, carry):
        c = pl.program_id(0)   # core-split index (parallel)
        i = pl.program_id(1)   # streaming step (arbitrary / sequential)

        # ---- per core-slice init ----
        @pl.when(i == 0)
        def _init():
            acc_img[...] = jnp.zeros_like(acc_img)
            acc_kl[...] = jnp.zeros_like(acc_kl)
            acc_tv[...] = jnp.zeros_like(acc_tv)
            carry[...] = jnp.zeros_like(carry)

        # ---- 00: image reconstruction loss (tiled partial sum of squared error) ----
        t_img = c * tiles_per_core + i
        do_img = jnp.logical_and(i < tiles_per_core, t_img < n_img_tiles)

        @pl.when(do_img)
        def _img():
            d = pred_ref[...].astype(jnp.float32) - gt_ref[...].astype(jnp.float32)
            rows_valid = img_rows - t_img * tile_rows   # mask ragged last tile (no pad copy)
            row_id = lax.broadcasted_iota(jnp.int32, (tile_rows, img_w), 0)
            dd = jnp.where(row_id < rows_valid, d * d, 0.0)
            if tile_rows % 8 == 0:
                # Fold into a vreg-shaped accumulator: VPU adds only; the cross-lane
                # reduction happens once, in the finalize step.
                acc_img[...] += jnp.sum(dd.reshape(tile_rows // 8, 8, img_w), axis=0)
            else:
                acc_img[0:1, :] += jnp.sum(dd, axis=0, keepdims=True)

        # ---- 01 / 02: neural-point-cloud KL + TV (tiled, core 0 only) ----
        do_pts = jnp.logical_and(c == 0, i < n_pt_tiles)

        @pl.when(do_pts)
        def _pts():
            pts_valid = n_pts - i * tile_pts
            prow = lax.broadcasted_iota(jnp.int32, (tile_pts, n_feat), 0)

            mu = mu_ref[...].astype(jnp.float32)
            lv = logvar_ref[...].astype(jnp.float32)
            kl_el = -0.5 * (1.0 + lv - mu * mu - jnp.exp(lv))
            acc_kl[...] += jnp.sum(jnp.where(prow < pts_valid, kl_el, 0.0))

            # TODO(synk): the true neighbor graph of the point cloud is model-defined;
            #             adjacency along the point index is used here (matches reference).
            f = feat_ref[...].astype(jnp.float32)
            f_next = pltpu.roll(f, shift=tile_pts - 1, axis=0)  # f_next[r] = f[(r+1) % tile_pts]
            in_tile = jnp.where(prow < pts_valid - 1, jnp.abs(f_next - f), 0.0)
            boundary = jnp.sum(jnp.abs(f[0:1, :] - carry[...]))  # stitch across tile boundary
            acc_tv[...] += jnp.sum(in_tile) + jnp.where(i > 0, boundary, 0.0)
            # Carry this tile's last row for the next tile (only full tiles have a successor).
            carry[...] = f[tile_pts - 1:tile_pts, :]

        # ---- finalize: one lane-dense (8,128) block of weighted partial losses per core ----
        @pl.when(i == n_inner - 1)
        def _finalize():
            img_l = (w_img * inv_n_img) * jnp.sum(acc_img[...])
            kl_l = (w_kl * inv_n_pts) * jnp.sum(acc_kl[...])
            tv_l = (w_tv * inv_tv) * jnp.sum(acc_tv[...])
            r = lax.broadcasted_iota(jnp.int32, (8, 128), 0)
            col = lax.broadcasted_iota(jnp.int32, (8, 128), 1)
            blk = jnp.where((r == 0) & (col == 0), img_l,
                  jnp.where((r == 0) & (col == 1), kl_l,
                  jnp.where((r == 0) & (col == 2), tv_l, 0.0)))
            out_ref[...] = blk

    return kernel


def pointnerf_loss(sample, pred, aux, iteration=0,
                   image_reconstruction_loss_weight=1.0,
                   neural_point_cloud_kl_loss_weight=1.0,
                   neural_point_cloud_tv_loss_weight=1.0):
    gt_img = sample["target_image"]                    # [B, 3, H, W]
    pred_img = pred["rendered_image"]                  # [B, 3, H, W]
    mu = aux["neural_point_cloud_feat_mu"]             # [N, C]
    logvar = aux["neural_point_cloud_feat_logvar"]     # [N, C]
    feat = aux["neural_point_cloud_features"]          # [N, C]

    # ---- image layout: zero-copy reshape, no materialized pad ----
    img_w = int(pred_img.shape[-1])
    n_img_el = int(math.prod(pred_img.shape))
    img_rows = n_img_el // img_w
    pred2d = pred_img.reshape(img_rows, img_w)
    gt2d = gt_img.reshape(img_rows, img_w)

    n_pts, n_feat = feat.shape

    # ---- generation-dependent tiling (v5e/v6e: big tiles; v7x: capped, 64 MiB VMEM) ----
    vmem_cap = _vmem_capacity_bytes()
    big_vmem = vmem_cap >= _BIG_VMEM_BYTES
    img_tile_bytes = _IMG_TILE_BYTES_BIG if big_vmem else _IMG_TILE_BYTES_SMALL
    vmem_limit = (64 if big_vmem else 48) * 1024 * 1024

    sub_img = max(_sublane(pred_img.dtype), _sublane(gt_img.dtype))
    item_img = max(jnp.dtype(pred_img.dtype).itemsize, jnp.dtype(gt_img.dtype).itemsize)
    rows_cap = max(sub_img, (img_tile_bytes // (img_w * item_img)) // sub_img * sub_img)
    tile_rows = img_rows if img_rows <= rows_cap else rows_cap
    n_img_tiles = _cdiv(img_rows, tile_rows)
    tiles_per_core = _cdiv(n_img_tiles, _NUM_CORE_SPLITS)

    sub_pts = max(_sublane(mu.dtype), _sublane(logvar.dtype), _sublane(feat.dtype))
    item_pts = max(jnp.dtype(mu.dtype).itemsize, jnp.dtype(logvar.dtype).itemsize,
                   jnp.dtype(feat.dtype).itemsize)
    pts_cap = max(sub_pts, (_PT_TILE_BYTES // (n_feat * item_pts)) // sub_pts * sub_pts)
    tile_pts = n_pts if n_pts <= pts_cap else pts_cap
    n_pt_tiles = _cdiv(n_pts, tile_pts)

    n_inner = max(tiles_per_core, n_pt_tiles)

    kernel = _make_kernel(
        img_rows=img_rows, tile_rows=tile_rows, img_w=img_w,
        n_img_tiles=n_img_tiles, tiles_per_core=tiles_per_core,
        n_pts=n_pts, n_feat=n_feat, tile_pts=tile_pts, n_pt_tiles=n_pt_tiles,
        n_inner=n_inner,
        inv_n_img=1.0 / n_img_el,
        inv_n_pts=1.0 / n_pts,
        inv_tv=1.0 / max(1, (n_pts - 1) * n_feat),
        w_img=float(image_reconstruction_loss_weight),
        w_kl=float(neural_point_cloud_kl_loss_weight),
        w_tv=float(neural_point_cloud_tv_loss_weight),
    )

    # Image tiles: core c streams tiles [c*tiles_per_core, ...); index clamped so idle
    # steps never re-issue a DMA.
    img_index_map = lambda c, i: (
        jnp.minimum(c * tiles_per_core + jnp.minimum(i, tiles_per_core - 1),
                    n_img_tiles - 1), 0)
    # Point tiles: streamed on core 0 only; pinned to the last tile elsewhere (no refetch).
    pts_index_map = lambda c, i: (
        jnp.where(c == 0, jnp.minimum(i, n_pt_tiles - 1), n_pt_tiles - 1), 0)

    out = pl.pallas_call(
        kernel,
        out_shape=jax.ShapeDtypeStruct((_NUM_CORE_SPLITS * 8, 128), jnp.float32),
        grid=(_NUM_CORE_SPLITS, n_inner),
        in_specs=[
            pl.BlockSpec((tile_rows, img_w), img_index_map),   # pred image tile
            pl.BlockSpec((tile_rows, img_w), img_index_map),   # gt image tile
            pl.BlockSpec((tile_pts, n_feat), pts_index_map),   # mu tile
            pl.BlockSpec((tile_pts, n_feat), pts_index_map),   # logvar tile
            pl.BlockSpec((tile_pts, n_feat), pts_index_map),   # features tile
        ],
        out_specs=pl.BlockSpec((8, 128), lambda c, i: (c, 0)),
        scratch_shapes=[
            pltpu.VMEM((8, img_w), jnp.float32),    # vreg-shaped SSE accumulator
            pltpu.VMEM((1, 1), jnp.float32),        # KL accumulator
            pltpu.VMEM((1, 1), jnp.float32),        # TV accumulator
            pltpu.VMEM((1, n_feat), jnp.float32),   # TV carry row (tile stitching)
        ],
        compiler_params=pltpu.CompilerParams(
            dimension_semantics=("parallel", "arbitrary"),
            vmem_limit_bytes=vmem_limit),
    )(pred2d, gt2d, mu, logvar, feat)

    partials = out.reshape(_NUM_CORE_SPLITS, 8, 128)[:, 0, :3]   # per-core weighted partials
    losses = jnp.sum(partials, axis=0)

    sub_losses = {
        "00_image_reconstruction_loss": losses[0],
        "01_neural_point_cloud_kl": losses[1],
        "02_neural_point_cloud_tv": losses[2],
    }
    pointwise_losses = {}
    total_loss = losses[0] + losses[1] + losses[2]
    return total_loss, sub_losses, pointwise_losses


def _reference(sample, pred, aux):
    pred_img = pred["rendered_image"].astype(jnp.float32)
    gt_img = sample["target_image"].astype(jnp.float32)
    mu = aux["neural_point_cloud_feat_mu"].astype(jnp.float32)
    lv = aux["neural_point_cloud_feat_logvar"].astype(jnp.float32)
    f = aux["neural_point_cloud_features"].astype(jnp.float32)
    mse = jnp.mean((pred_img - gt_img) ** 2)
    kl = jnp.mean(jnp.sum(-0.5 * (1.0 + lv - mu * mu - jnp.exp(lv)), axis=-1))
    tv = jnp.mean(jnp.abs(f[1:] - f[:-1]))
    return mse, kl, tv


if __name__ == "__main__":
    key = jax.random.PRNGKey(0)
    k1, k2, k3, k4, k5 = jax.random.split(key, 5)

    B, C, H, W = 2, 3, 16, 16
    N_PTS, N_FEAT = 64, 32

    sample = {"target_image": jax.random.uniform(k1, (B, C, H, W), jnp.float32)}
    pred = {"rendered_image": jax.random.uniform(k2, (B, C, H, W), jnp.float32)}
    aux = {
        "neural_point_cloud_feat_mu":
            0.5 * jax.random.normal(k3, (N_PTS, N_FEAT), jnp.float32),
        "neural_point_cloud_feat_logvar":
            0.1 * jax.random.normal(k4, (N_PTS, N_FEAT), jnp.float32),
        "neural_point_cloud_features":
            jax.random.normal(k5, (N_PTS, N_FEAT), jnp.float32),
    }

    total, sub_losses, pointwise_losses = pointnerf_loss(sample, pred, aux, iteration=0)
    total = jax.block_until_ready(total)

    ref_mse, ref_kl, ref_tv = _reference(sample, pred, aux)
    ref_total = jax.block_until_ready(ref_mse + ref_kl + ref_tv)

    assert jnp.allclose(sub_losses["00_image_reconstruction_loss"], ref_mse,
                        rtol=1e-5, atol=1e-5)
    assert jnp.allclose(sub_losses["01_neural_point_cloud_kl"], ref_kl,
                        rtol=1e-5, atol=1e-5)
    assert jnp.allclose(sub_losses["02_neural_point_cloud_tv"], ref_tv,
                        rtol=1e-5, atol=1e-5)
    assert jnp.allclose(total, ref_total, rtol=1e-5, atol=1e-5), (total, ref_total)

    print("KERNEL_OK")
</pallas_src>

<mosaic_0001>
module attributes {stable_mosaic.version = 11 : i64} {
  func.func @kernel(%arg0: i32, %arg1: i32, %arg2: memref<96x16xf32, #tpu.memory_space<vmem>>, %arg3: memref<96x16xf32, #tpu.memory_space<vmem>>, %arg4: memref<64x32xf32, #tpu.memory_space<vmem>>, %arg5: memref<64x32xf32, #tpu.memory_space<vmem>>, %arg6: memref<64x32xf32, #tpu.memory_space<vmem>>, %arg7: memref<8x128xf32, #tpu.memory_space<vmem>>, %arg8: memref<8x16xf32, #tpu.memory_space<vmem>>, %arg9: memref<1x1xf32, #tpu.memory_space<vmem>>, %arg10: memref<1x1xf32, #tpu.memory_space<vmem>>, %arg11: memref<1x32xf32, #tpu.memory_space<vmem>>) attributes {dimension_semantics = [#tpu.dimension_semantics<parallel>, #tpu.dimension_semantics<arbitrary>], iteration_bounds = array<i64: 2, 1>, scalar_prefetch = 0 : i64, scratch_operands = 4 : i64, tpu.core_type = #tpu.core_type<tc>, window_params = [{transform_indices = @transform_0, window_bounds = array<i64: 96, 16>}, {transform_indices = @transform_1, window_bounds = array<i64: 96, 16>}, {transform_indices = @transform_2, window_bounds = array<i64: 64, 32>}, {transform_indices = @transform_3, window_bounds = array<i64: 64, 32>}, {transform_indices = @transform_4, window_bounds = array<i64: 64, 32>}, {transform_indices = @transform_5, window_bounds = array<i64: 8, 128>}]} {
    %c0_i32 = arith.constant 0 : i32
    %0 = arith.cmpi eq, %arg1, %c0_i32 : i32
    %1 = arith.extui %0 : i1 to i32
    %c0_i32_0 = arith.constant 0 : i32
    %2 = arith.cmpi ne, %1, %c0_i32_0 : i32
    scf.if %2 {
      %cst = arith.constant 0.000000e+00 : f32
      %18 = vector.broadcast %cst : f32 to vector<8x16xf32>
      %c0 = arith.constant 0 : index
      %c0_9 = arith.constant 0 : index
      %19 = vector.load %arg8[%c0, %c0_9] : memref<8x16xf32, #tpu.memory_space<vmem>>, vector<8x16xf32>
      tpu.vector_store %arg8[%c0, %c0_9], %18 {strides = array<i32>} : memref<8x16xf32, #tpu.memory_space<vmem>>, vector<8x16xf32>,
      %cst_10 = arith.constant 0.000000e+00 : f32
      %20 = vector.broadcast %cst_10 : f32 to vector<1x1xf32>
      %c0_11 = arith.constant 0 : index
      %c0_12 = arith.constant 0 : index
      %21 = vector.load %arg9[%c0_11, %c0_12] : memref<1x1xf32, #tpu.memory_space<vmem>>, vector<1x1xf32>
      tpu.vector_store %arg9[%c0_11, %c0_12], %20 {strides = array<i32>} : memref<1x1xf32, #tpu.memory_space<vmem>>, vector<1x1xf32>,
      %cst_13 = arith.constant 0.000000e+00 : f32
      %22 = vector.broadcast %cst_13 : f32 to vector<1x1xf32>
      %c0_14 = arith.constant 0 : index
      %c0_15 = arith.constant 0 : index
      %23 = vector.load %arg10[%c0_14, %c0_15] : memref<1x1xf32, #tpu.memory_space<vmem>>, vector<1x1xf32>
      tpu.vector_store %arg10[%c0_14, %c0_15], %22 {strides = array<i32>} : memref<1x1xf32, #tpu.memory_space<vmem>>, vector<1x1xf32>,
      %cst_16 = arith.constant 0.000000e+00 : f32
      %24 = vector.broadcast %cst_16 : f32 to vector<1x32xf32>
      %c0_17 = arith.constant 0 : index
      %c0_18 = arith.constant 0 : index
      %25 = vector.load %arg11[%c0_17, %c0_18] : memref<1x32xf32, #tpu.memory_space<vmem>>, vector<1x32xf32>
      tpu.vector_store %arg11[%c0_17, %c0_18], %24 {strides = array<i32>} : memref<1x32xf32, #tpu.memory_space<vmem>>, vector<1x32xf32>,
    } else {
    }
    %c1_i32 = arith.constant 1 : i32
    %3 = arith.muli %arg0, %c1_i32 : i32
    %4 = arith.addi %3, %arg1 : i32
    %c1_i32_1 = arith.constant 1 : i32
    %5 = arith.cmpi slt, %arg1, %c1_i32_1 : i32
    %c1_i32_2 = arith.constant 1 : i32
    %6 = arith.cmpi slt, %4, %c1_i32_2 : i32
    %7 = arith.andi %5, %6 : i1
    %8 = arith.extui %7 : i1 to i32
    %c0_i32_3 = arith.constant 0 : i32
    %9 = arith.cmpi ne, %8, %c0_i32_3 : i32
    scf.if %9 {
      %c0 = arith.constant 0 : index
      %c0_9 = arith.constant 0 : index
      %18 = vector.load %arg2[%c0, %c0_9] : memref<96x16xf32, #tpu.memory_space<vmem>>, vector<96x16xf32>
      %c0_10 = arith.constant 0 : index
      %c0_11 = arith.constant 0 : index
      %19 = vector.load %arg3[%c0_10, %c0_11] : memref<96x16xf32, #tpu.memory_space<vmem>>, vector<96x16xf32>
      %20 = arith.subf %18, %19 : vector<96x16xf32>
      %c96_i32 = arith.constant 96 : i32
      %21 = arith.muli %4, %c96_i32 : i32
      %c96_i32_12 = arith.constant 96 : i32
      %22 = arith.subi %c96_i32_12, %21 : i32
      %23 = tpu.iota {dimensions = array<i32: 0>} : vector<96x16xi32>
      %24 = vector.broadcast %22 : i32 to vector<96x16xi32>
      %25 = arith.cmpi slt, %23, %24 : vector<96x16xi32>
      %26 = arith.mulf %20, %20 : vector<96x16xf32>
      %cst = arith.constant 0.000000e+00 : f32
      %27 = vector.broadcast %cst : f32 to vector<96x16xf32>
      %28 = arith.select %25, %26, %27 : vector<96x16xi1>, vector<96x16xf32>
      %c0_13 = arith.constant 0 : index
      %c0_14 = arith.constant 0 : index
      %29 = vector.load %arg8[%c0_13, %c0_14] : memref<8x16xf32, #tpu.memory_space<vmem>>, vector<8x16xf32>
      %30 = vector.shape_cast %28 : vector<96x16xf32> to vector<12x8x16xf32>
      %cst_15 = arith.constant dense<0.000000e+00> : vector<8x16xf32>
      %31 = vector.multi_reduction <add>, %30, %cst_15 [0] : vector<12x8x16xf32> to vector<8x16xf32>
      %32 = arith.addf %29, %31 : vector<8x16xf32>
      %c0_16 = arith.constant 0 : index
      %c0_17 = arith.constant 0 : index
      %33 = vector.load %arg8[%c0_16, %c0_17] : memref<8x16xf32, #tpu.memory_space<vmem>>, vector<8x16xf32>
      tpu.vector_store %arg8[%c0_16, %c0_17], %32 {strides = array<i32>} : memref<8x16xf32, #tpu.memory_space<vmem>>, vector<8x16xf32>,
    } else {
    }
    %c0_i32_4 = arith.constant 0 : i32
    %10 = arith.cmpi eq, %arg0, %c0_i32_4 : i32
    %c1_i32_5 = arith.constant 1 : i32
    %11 = arith.cmpi slt, %arg1, %c1_i32_5 : i32
    %12 = arith.andi %10, %11 : i1
    %13 = arith.extui %12 : i1 to i32
    %c0_i32_6 = arith.constant 0 : i32
    %14 = arith.cmpi ne, %13, %c0_i32_6 : i32
    scf.if %14 {
      %c64_i32 = arith.constant 64 : i32
      %18 = arith.muli %arg1, %c64_i32 : i32
      %c64_i32_9 = arith.constant 64 : i32
      %19 = arith.subi %c64_i32_9, %18 : i32
      %20 = tpu.iota {dimensions = array<i32: 0>} : vector<64x32xi32>
      %c0 = arith.constant 0 : index
      %c0_10 = arith.constant 0 : index
      %21 = vector.load %arg4[%c0, %c0_10] : memref<64x32xf32, #tpu.memory_space<vmem>>, vector<64x32xf32>
      %c0_11 = arith.constant 0 : index
      %c0_12 = arith.constant 0 : index
      %22 = vector.load %arg5[%c0_11, %c0_12] : memref<64x32xf32, #tpu.memory_space<vmem>>, vector<64x32xf32>
      %cst = arith.constant 1.000000e+00 : f32
      %23 = vector.broadcast %cst : f32 to vector<64x32xf32>
      %24 = arith.addf %23, %22 : vector<64x32xf32>
      %25 = arith.mulf %21, %21 : vector<64x32xf32>
      %26 = arith.subf %24, %25 : vector<64x32xf32>
      %27 = math.exp %22 : vector<64x32xf32>
      %28 = arith.subf %26, %27 : vector<64x32xf32>
      %cst_13 = arith.constant -5.000000e-01 : f32
      %29 = vector.broadcast %cst_13 : f32 to vector<64x32xf32>
      %30 = arith.mulf %29, %28 : vector<64x32xf32>
      %c0_14 = arith.constant 0 : index
      %c0_15 = arith.constant 0 : index
      %31 = vector.load %arg9[%c0_14, %c0_15] : memref<1x1xf32, #tpu.memory_space<vmem>>, vector<1x1xf32>
      %32 = vector.broadcast %19 : i32 to vector<64x32xi32>
      %33 = arith.cmpi slt, %20, %32 : vector<64x32xi32>
      %cst_16 = arith.constant 0.000000e+00 : f32
      %34 = vector.broadcast %cst_16 : f32 to vector<64x32xf32>
      %35 = arith.select %33, %30, %34 : vector<64x32xi1>, vector<64x32xf32>
      %36 = vector.shape_cast %35 : vector<64x32xf32> to vector<1x64x32xf32>
      %cst_17 = arith.constant dense<0.000000e+00> : vector<1xf32>
      %37 = vector.multi_reduction <add>, %36, %cst_17 [1, 2] : vector<1x64x32xf32> to vector<1xf32>
      %38 = vector.shape_cast %37 : vector<1xf32> to vector<1x1x1xf32>
      %39 = vector.extract %38[0, 0, 0] : f32 from vector<1x1x1xf32>
      %40 = vector.broadcast %39 : f32 to vector<1x1xf32>
      %41 = arith.addf %31, %40 : vector<1x1xf32>
      %c0_18 = arith.constant 0 : index
      %c0_19 = arith.constant 0 : index
      %42 = vector.load %arg9[%c0_18, %c0_19] : memref<1x1xf32, #tpu.memory_space<vmem>>, vector<1x1xf32>
      tpu.vector_store %arg9[%c0_18, %c0_19], %41 {strides = array<i32>} : memref<1x1xf32, #tpu.memory_space<vmem>>, vector<1x1xf32>,
      %c0_20 = arith.constant 0 : index
      %c0_21 = arith.constant 0 : index
      %43 = vector.load %arg6[%c0_20, %c0_21] : memref<64x32xf32, #tpu.memory_space<vmem>>, vector<64x32xf32>
      %c63_i32 = arith.constant 63 : i32
      %44 = tpu.dynamic_rotate %43 by %c63_i32 dim 0 : vector<64x32xf32>, i32 -> vector<64x32xf32>
      %c1_i32_22 = arith.constant 1 : i32
      %45 = arith.subi %19, %c1_i32_22 : i32
      %46 = vector.broadcast %45 : i32 to vector<64x32xi32>
      %47 = arith.cmpi slt, %20, %46 : vector<64x32xi32>
      %48 = arith.subf %44, %43 : vector<64x32xf32>
      %49 = math.absf %48 : vector<64x32xf32>
      %cst_23 = arith.constant 0.000000e+00 : f32
      %50 = vector.broadcast %cst_23 : f32 to vector<64x32xf32>
      %51 = arith.select %47, %49, %50 : vector<64x32xi1>, vector<64x32xf32>
      %52 = vector.extract_strided_slice %43 {offsets = [0, 0], sizes = [1, 32], strides = [1, 1]} : vector<64x32xf32> to vector<1x32xf32>
      %c0_24 = arith.constant 0 : index
      %c0_25 = arith.constant 0 : index
      %53 = vector.load %arg11[%c0_24, %c0_25] : memref<1x32xf32, #tpu.memory_space<vmem>>, vector<1x32xf32>
      %54 = arith.subf %52, %53 : vector<1x32xf32>
      %55 = math.absf %54 : vector<1x32xf32>
      %56 = vector.shape_cast %55 : vector<1x32xf32> to vector<1x1x32xf32>
      %cst_26 = arith.constant dense<0.000000e+00> : vector<1xf32>
      %57 = vector.multi_reduction <add>, %56, %cst_26 [1, 2] : vector<1x1x32xf32> to vector<1xf32>
      %58 = vector.shape_cast %57 : vector<1xf32> to vector<1x1x1xf32>
      %59 = vector.extract %58[0, 0, 0] : f32 from vector<1x1x1xf32>
      %c0_27 = arith.constant 0 : index
      %c0_28 = arith.constant 0 : index
      %60 = vector.load %arg10[%c0_27, %c0_28] : memref<1x1xf32, #tpu.memory_space<vmem>>, vector<1x1xf32>
      %61 = vector.shape_cast %51 : vector<64x32xf32> to vector<1x64x32xf32>
      %cst_29 = arith.constant dense<0.000000e+00> : vector<1xf32>
      %62 = vector.multi_reduction <add>, %61, %cst_29 [1, 2] : vector<1x64x32xf32> to vector<1xf32>
      %63 = vector.shape_cast %62 : vector<1xf32> to vector<1x1x1xf32>
      %64 = vector.extract %63[0, 0, 0] : f32 from vector<1x1x1xf32>
      %c0_i32_30 = arith.constant 0 : i32
      %65 = arith.cmpi sgt, %arg1, %c0_i32_30 : i32
      %cst_31 = arith.constant 0.000000e+00 : f32
      %66 = arith.select %65, %59, %cst_31 : f32
      %67 = arith.addf %64, %66 : f32
      %68 = vector.broadcast %67 : f32 to vector<1x1xf32>
      %69 = arith.addf %60, %68 : vector<1x1xf32>
      %c0_32 = arith.constant 0 : index
      %c0_33 = arith.constant 0 : index
      %70 = vector.load %arg10[%c0_32, %c0_33] : memref<1x1xf32, #tpu.memory_space<vmem>>, vector<1x1xf32>
      tpu.vector_store %arg10[%c0_32, %c0_33], %69 {strides = array<i32>} : memref<1x1xf32, #tpu.memory_space<vmem>>, vector<1x1xf32>,
      %71 = vector.extract_strided_slice %43 {offsets = [63, 0], sizes = [1, 32], strides = [1, 1]} : vector<64x32xf32> to vector<1x32xf32>
      %c0_34 = arith.constant 0 : index
      %c0_35 = arith.constant 0 : index
      %72 = vector.load %arg11[%c0_34, %c0_35] : memref<1x32xf32, #tpu.memory_space<vmem>>, vector<1x32xf32>
      tpu.vector_store %arg11[%c0_34, %c0_35], %71 {strides = array<i32>} : memref<1x32xf32, #tpu.memory_space<vmem>>, vector<1x32xf32>,
    } else {
    }
    %c0_i32_7 = arith.constant 0 : i32
    %15 = arith.cmpi eq, %arg1, %c0_i32_7 : i32
    %16 = arith.extui %15 : i1 to i32
    %c0_i32_8 = arith.constant 0 : i32
    %17 = arith.cmpi ne, %16, %c0_i32_8 : i32
    scf.if %17 {
      %c0 = arith.constant 0 : index
      %c0_9 = arith.constant 0 : index
      %18 = vector.load %arg8[%c0, %c0_9] : memref<8x16xf32, #tpu.memory_space<vmem>>, vector<8x16xf32>
      %19 = vector.shape_cast %18 : vector<8x16xf32> to vector<1x8x16xf32>
      %cst = arith.constant dense<0.000000e+00> : vector<1xf32>
      %20 = vector.multi_reduction <add>, %19, %cst [1, 2] : vector<1x8x16xf32> to vector<1xf32>
      %21 = vector.shape_cast %20 : vector<1xf32> to vector<1x1x1xf32>
      %22 = vector.extract %21[0, 0, 0] : f32 from vector<1x1x1xf32>
      %cst_10 = arith.constant 6.51041686E-4 : f32
      %23 = arith.mulf %cst_10, %22 : f32
      %c0_11 = arith.constant 0 : index
      %c0_12 = arith.constant 0 : index
      %24 = vector.load %arg9[%c0_11, %c0_12] : memref<1x1xf32, #tpu.memory_space<vmem>>, vector<1x1xf32>
      %25 = vector.shape_cast %24 : vector<1x1xf32> to vector<1x1x1xf32>
      %cst_13 = arith.constant dense<0.000000e+00> : vector<1xf32>
      %26 = vector.multi_reduction <add>, %25, %cst_13 [1, 2] : vector<1x1x1xf32> to vector<1xf32>
      %27 = vector.shape_cast %26 : vector<1xf32> to vector<1x1x1xf32>
      %28 = vector.extract %27[0, 0, 0] : f32 from vector<1x1x1xf32>
      %cst_14 = arith.constant 1.562500e-02 : f32
      %29 = arith.mulf %cst_14, %28 : f32
      %c0_15 = arith.constant 0 : index
      %c0_16 = arith.constant 0 : index
      %30 = vector.load %arg10[%c0_15, %c0_16] : memref<1x1xf32, #tpu.memory_space<vmem>>, vector<1x1xf32>
      %31 = vector.shape_cast %30 : vector<1x1xf32> to vector<1x1x1xf32>
      %cst_17 = arith.constant dense<0.000000e+00> : vector<1xf32>
      %32 = vector.multi_reduction <add>, %31, %cst_17 [1, 2] : vector<1x1x1xf32> to vector<1xf32>
      %33 = vector.shape_cast %32 : vector<1xf32> to vector<1x1x1xf32>
      %34 = vector.extract %33[0, 0, 0] : f32 from vector<1x1x1xf32>
      %cst_18 = arith.constant 4.96031775E-4 : f32
      %35 = arith.mulf %cst_18, %34 : f32
      %36 = tpu.iota {dimensions = array<i32: 0>} : vector<8x128xi32>
      %37 = tpu.iota {dimensions = array<i32: 1>} : vector<8x128xi32>
      %c0_i32_19 = arith.constant 0 : i32
      %38 = vector.broadcast %c0_i32_19 : i32 to vector<8x128xi32>
      %39 = arith.cmpi eq, %36, %38 : vector<8x128xi32>
      %c0_i32_20 = arith.constant 0 : i32
      %40 = vector.broadcast %c0_i32_20 : i32 to vector<8x128xi32>
      %41 = arith.cmpi eq, %37, %40 : vector<8x128xi32>
      %42 = arith.andi %39, %41 : vector<8x128xi1>
      %c0_i32_21 = arith.constant 0 : i32
      %43 = vector.broadcast %c0_i32_21 : i32 to vector<8x128xi32>
      %44 = arith.cmpi eq, %36, %43 : vector<8x128xi32>
      %c1_i32_22 = arith.constant 1 : i32
      %45 = vector.broadcast %c1_i32_22 : i32 to vector<8x128xi32>
      %46 = arith.cmpi eq, %37, %45 : vector<8x128xi32>
      %47 = arith.andi %44, %46 : vector<8x128xi1>
      %c0_i32_23 = arith.constant 0 : i32
      %48 = vector.broadcast %c0_i32_23 : i32 to vector<8x128xi32>
      %49 = arith.cmpi eq, %36, %48 : vector<8x128xi32>
      %c2_i32 = arith.constant 2 : i32
      %50 = vector.broadcast %c2_i32 : i32 to vector<8x128xi32>
      %51 = arith.cmpi eq, %37, %50 : vector<8x128xi32>
      %52 = arith.andi %49, %51 : vector<8x128xi1>
      %cst_24 = arith.constant 0.000000e+00 : f32
      %53 = vector.broadcast %35 : f32 to vector<8x128xf32>
      %54 = vector.broadcast %cst_24 : f32 to vector<8x128xf32>
      %55 = arith.select %52, %53, %54 : vector<8x128xi1>, vector<8x128xf32>
      %56 = vector.broadcast %29 : f32 to vector<8x128xf32>
      %57 = arith.select %47, %56, %55 : vector<8x128xi1>, vector<8x128xf32>
      %58 = vector.broadcast %23 : f32 to vector<8x128xf32>
      %59 = arith.select %42, %58, %57 : vector<8x128xi1>, vector<8x128xf32>
      %c0_25 = arith.constant 0 : index
      %c0_26 = arith.constant 0 : index
      %60 = vector.load %arg7[%c0_25, %c0_26] : memref<8x128xf32, #tpu.memory_space<vmem>>, vector<8x128xf32>
      tpu.vector_store %arg7[%c0_25, %c0_26], %59 {strides = array<i32>} : memref<8x128xf32, #tpu.memory_space<vmem>>, vector<8x128xf32>,
    } else {
    }
    return
  }
  func.func @transform_0(%arg0: i32, %arg1: i32) -> (i32, i32) {
    %c1_i32 = arith.constant 1 : i32
    %0 = arith.muli %arg0, %c1_i32 : i32
    %c0_i32 = arith.constant 0 : i32
    %1 = arith.minsi %arg1, %c0_i32 : i32
    %2 = arith.addi %0, %1 : i32
    %c0_i32_0 = arith.constant 0 : i32
    %3 = arith.minsi %2, %c0_i32_0 : i32
    %c0_i32_1 = arith.constant 0 : i32
    %c0_i32_2 = arith.constant 0 : i32
    return %3, %c0_i32_1 : i32, i32
  }
  func.func @transform_1(%arg0: i32, %arg1: i32) -> (i32, i32) {
    %c1_i32 = arith.constant 1 : i32
    %0 = arith.muli %arg0, %c1_i32 : i32
    %c0_i32 = arith.constant 0 : i32
    %1 = arith.minsi %arg1, %c0_i32 : i32
    %2 = arith.addi %0, %1 : i32
    %c0_i32_0 = arith.constant 0 : i32
    %3 = arith.minsi %2, %c0_i32_0 : i32
    %c0_i32_1 = arith.constant 0 : i32
    %c0_i32_2 = arith.constant 0 : i32
    return %3, %c0_i32_1 : i32, i32
  }
  func.func @transform_2(%arg0: i32, %arg1: i32) -> (i32, i32) {
    %c0_i32 = arith.constant 0 : i32
    %0 = arith.cmpi eq, %arg0, %c0_i32 : i32
    %c0_i32_0 = arith.constant 0 : i32
    %1 = arith.minsi %arg1, %c0_i32_0 : i32
    %c0_i32_1 = arith.constant 0 : i32
    %2 = arith.select %0, %1, %c0_i32_1 : i32
    %c0_i32_2 = arith.constant 0 : i32
    %c0_i32_3 = arith.constant 0 : i32
    return %2, %c0_i32_2 : i32, i32
  }
  func.func @transform_3(%arg0: i32, %arg1: i32) -> (i32, i32) {
    %c0_i32 = arith.constant 0 : i32
    %0 = arith.cmpi eq, %arg0, %c0_i32 : i32
    %c0_i32_0 = arith.constant 0 : i32
    %1 = arith.minsi %arg1, %c0_i32_0 : i32
    %c0_i32_1 = arith.constant 0 : i32
    %2 = arith.select %0, %1, %c0_i32_1 : i32
    %c0_i32_2 = arith.constant 0 : i32
    %c0_i32_3 = arith.constant 0 : i32
    return %2, %c0_i32_2 : i32, i32
  }
  func.func @transform_4(%arg0: i32, %arg1: i32) -> (i32, i32) {
    %c0_i32 = arith.constant 0 : i32
    %0 = arith.cmpi eq, %arg0, %c0_i32 : i32
    %c0_i32_0 = arith.constant 0 : i32
    %1 = arith.minsi %arg1, %c0_i32_0 : i32
    %c0_i32_1 = arith.constant 0 : i32
    %2 = arith.select %0, %1, %c0_i32_1 : i32
    %c0_i32_2 = arith.constant 0 : i32
    %c0_i32_3 = arith.constant 0 : i32
    return %2, %c0_i32_2 : i32, i32
  }
  func.func @transform_5(%arg0: i32, %arg1: i32) -> (i32, i32) {
    %c0_i32 = arith.constant 0 : i32
    %c0_i32_0 = arith.constant 0 : i32
    return %arg0, %c0_i32 : i32, i32
  }
}

</mosaic_0001>

<bundles_post_ra>
// kernel: tpu_custom_call.1
= control target key start
LH: loop header
LB: loop body
LE: loop exit
PB: predicated region body
PF: predicated region fallthrough
CT: control target
= control target key end

     0   :  { %10 = vsyncpa [#allocation7], 0  ;;  %s1590_s0 = inlined_call_operand.vmem [shape: f32[96,16], index: 0, kind: input, shape index: {}]   ;;  %s1591_s1 = inlined_call_operand.vmem [shape: f32[96,16], index: 1, kind: input, shape index: {}]   ;;  %s1592_s2 = inlined_call_operand.vmem [shape: f32[64,32], index: 2, kind: input, shape index: {}]   ;;  %s1593_s3 = inlined_call_operand.vmem [shape: f32[64,32], index: 3, kind: input, shape index: {}]   ;;  %s1594_s4 = inlined_call_operand.vmem [shape: f32[64,32], index: 4, kind: input, shape index: {}]   ;;  %s1595_s5 = inlined_call_operand.hbm [shape: f32[16,128], index: 5, kind: output, shape index: {}]  }
   0x1   :  { %12 = vsyncpa [#allocation7 + $0x1], 0  ;;  %s1235_s18 = smov 0   ;;  %s1237_s19 = smov 0  }
   0x2   :  { %s1239_s20 = smov 0   ;;  %s1241_s21 = smov 0  }
   0x3   :  { %s1243_s22 = smov 0   ;;  %s1245_s23 = smov 0  }
   0x4 LB: > { %s1024_s24 = sadd.s32 4294967295, %s1201_s23   ;;  %s1025_s25 = sadd.s32 4294967294, %s1201_s23   ;;  %s1201_s23 = sphi %s1245_s23, %s18_s23   ;;  %s1197_s22 = sphi %s1243_s22, %s1602_s22   ;;  %s1193_s21 = sphi %s1241_s21, %s1601_s21   ;;  %s1189_s20 = sphi %s1239_s20, %s1600_s20   ;;  %s1185_s19 = sphi %s1237_s19, %s1599_s19   ;;  %s1181_s18 = sphi %s1235_s18, %s1598_s18  }
   0x5   : > { %s30_s26 = sadd.s32 1, %s1197_s22  ;;  %s211_s27 = sadd.s32 1, %s1189_s20 }
   0x6   : > { %p32_p0 = scmp.ge.s32.totalorder %s30_s26, 2  ;;  %p221_p1 = scmp.ne.s32.totalorder %s1189_s20, %s1185_s19 }
   0x7   : > { %p222_p2 = scmp.eq.s32.totalorder %s1024_s24, 1  ;;  %p227_p3 = scmp.ne.s32.totalorder %s1185_s19, %s1181_s18 }
   0x8   : > { %s1604_s26 = smov (%p32_p0, %s30_s26), 0  ;;  %p228_p5 = scmp.eq.s32.totalorder %s1025_s25, 1 }
   0x9   : > { %p1275_p4 = por %p222_p2, %p221_p1  ;;  %s208_s29 = ssub.s32 %s1197_s22, %s1604_s26 }
   0xa   : > { %p1031_p6 = scmp.ge.s32.totalorder %s1201_s23, 1  ;;  %p209_p7 = scmp.eq.s32.totalorder %s208_s29, 0 }
   0xb   : > { %p1282_p8 = por %p228_p5, %p227_p3  ;;  %p335_p9 = scmp.lt.s32.totalorder %s1201_s23, 3 }
   0xc   : > { %s1288_s6 = scalar_select %p209_p7, %s1189_s20, %s211_s27  }
   0xd   : > { %p336_p10 = pnand %p1031_p6, %p335_p9 }
   0xe   : > { %s402_s7 = sand.u32 (!%p336_p10), 1, %s1185_s19   ;;  %p408_p11 = scmp.lt.s32.totalorder (!%p336_p10), %s1193_s21, 0 }
   0xf   : > { %339 = sbr.rel (%p336_p10) target bundleno = 536 (0x218), region = 40  ;;  %s1294_s8 = sshll.u32 (!%p336_p10), %s402_s7, 3 }
  0x10   : > { %p492_p12 = scmp.lt.s32.totalorder (!%p336_p10), %s1193_s21, 1  ;;  %s404_s24 = scalar_lea.vmem (!%p336_p10), [#allocation6], %s1294_s8 }
  0x14   : > { %vm483_vm0 = vcmask 130048   ;;  %vm485_vm1 = vcmask 0   ;;  %v1203_v0 = vmov 0.0   ;;  %s409_s9 = scalar_select %p408_p11, %s1193_s21, 0  ;;  %v535_v1 = vlaneseq (%p492_p12) }
  0x15   : > { %484 = vst.msk [vmem:[#allocation2] sm:$0xff] %vm483_vm0, %v1203_v0  ;;  %s533_s25 = smul.u32 (%p492_p12), 96, %s1193_s21 }
  0x16   : > { %486 = vst.msk [vmem:[#allocation3] sm:$0x1] %vm485_vm1, %v1203_v0  ;;  %487 = vst.msk [vmem:[#allocation4] sm:$0x1] %vm485_vm1, %v1203_v0  ;;  %s410_s10 = smul.u32 12, %s409_s9  ;;  %v1316_v5 = vshrl.u32 (%p492_p12), %v535_v1, 7 }
  0x17   : > { %s534_s27 = ssub.s32 (%p492_p12), 96, %s533_s25 }
  0x18   : > { %p411_p13 = scmp.lt.s32.totalorder %s410_s10, 11  ;;  %496 = sbr.rel (!%p492_p12) target bundleno = 63 (0x3f), region = 48  ;;  %v1323_v12 = vstv (%p492_p12), %s534_s27  ;;  %v537_v17 = vadd.s32 (%p492_p12), 8, %v1316_v5  ;;  %v538_v18 = vadd.s32 (%p492_p12), 16, %v1316_v5  ;;  %v539_v22 = vadd.s32 (%p492_p12), 24, %v1316_v5 }
  0x19   : > { %v540_v24 = vadd.s32 (%p492_p12), 32, %v1316_v5  ;;  %vm549_vm2 = vcmp.lt.s32.totalorder (%p492_p12), %v1316_v5, %v1323_v12  ;;  %v541_v34 = vadd.s32 (%p492_p12), 40, %v1316_v5  ;;  %v542_v42 = vadd.s32 (%p492_p12), 48, %v1316_v5 }
  0x1a   : > { %s1606_s10 = smov (!%p411_p13, %s410_s10), 11  ;;  %vm550_vm3 = vcmp.lt.s32.totalorder (%p492_p12), %v537_v17, %v1323_v12  ;;  %vm551_vm4 = vcmp.lt.s32.totalorder (%p492_p12), %v538_v18, %v1323_v12  ;;  %vm552_vm5 = vcmp.lt.s32.totalorder (%p492_p12), %v539_v22, %v1323_v12  ;;  %v543_v49 = vadd.s32 (%p492_p12), 56, %v1316_v5 }
  0x1b   : > { %s1033_s11 = sshll.u32 %s1606_s10, 3  ;;  %vm553_vm6 = vcmp.lt.s32.totalorder (%p492_p12), %v540_v24, %v1323_v12  ;;  %vm554_vm7 = vcmp.lt.s32.totalorder (%p492_p12), %v541_v34, %v1323_v12  ;;  %v544_v58 = vadd.s32 (%p492_p12), 64, %v1316_v5  ;;  %vm555_vm8 = vcmp.lt.s32.totalorder (%p492_p12), %v542_v42, %v1323_v12 }
  0x1c   : > { %s1304_s14 = scalar_lea.vmem %s1590_s0, %s1033_s11  ;;  %s1309_s17 = scalar_lea.vmem %s1591_s1, %s1033_s11  ;;  %vm556_vm9 = vcmp.lt.s32.totalorder (%p492_p12), %v543_v49, %v1323_v12  ;;  %v585_v34 = vld [vmem:[#allocation2] sm:$0xff] (%p492_p12) }
  0x1d   : > { %v497_v2 = vld [vmem:[%s1304_s14] sm:$0xff]  ;;  %v498_v3 = vld [vmem:[%s1304_s14 + $0x8] sm:$0xff]  ;;  %v499_v6 = vld [vmem:[%s1304_s14 + $0x10] sm:$0xff]  ;;  %vm557_vm10 = vcmp.lt.s32.totalorder %v544_v58, %v1323_v12 }
  0x1e   : > { %v509_v4 = vld [vmem:[%s1309_s17] sm:$0xff]  ;;  %v510_v7 = vld [vmem:[%s1309_s17 + $0x8] sm:$0xff]  ;;  %v511_v8 = vld [vmem:[%s1309_s17 + $0x10] sm:$0xff] }
  0x1f   : > { %v500_v9 = vld [vmem:[%s1304_s14 + $0x18] sm:$0xff]  ;;  %v521_v11 = vsub.f32 %v497_v2, %v509_v4  ;;  %v501_v13 = vld [vmem:[%s1304_s14 + $0x20] sm:$0xff]  ;;  %v522_v15 = vsub.f32 %v498_v3, %v510_v7  ;;  %v523_v16 = vsub.f32 %v499_v6, %v511_v8  ;;  %v502_v20 = vld [vmem:[%s1304_s14 + $0x28] sm:$0xff]  ;;  %v545_v2 = vadd.s32 72, %v1316_v5 }
  0x20   : > { %v512_v10 = vld [vmem:[%s1309_s17 + $0x18] sm:$0xff]  ;;  %v513_v14 = vld [vmem:[%s1309_s17 + $0x20] sm:$0xff]  ;;  %v514_v21 = vld [vmem:[%s1309_s17 + $0x28] sm:$0xff] }
  0x21   : > { %v524_v19 = vsub.f32 %v500_v9, %v512_v10  ;;  %v525_v23 = vsub.f32 %v501_v13, %v513_v14  ;;  %v561_v25 = vmul.f32 %v521_v11, %v521_v11  ;;  %v503_v26 = vld [vmem:[%s1304_s14 + $0x30] sm:$0xff]  ;;  %v562_v28 = vmul.f32 %v522_v15, %v522_v15  ;;  %v504_v32 = vld [vmem:[%s1304_s14 + $0x38] sm:$0xff]  ;;  %v505_v40 = vld [vmem:[%s1304_s14 + $0x40] sm:$0xff] }
  0x22   : > { %v515_v27 = vld [vmem:[%s1309_s17 + $0x30] sm:$0xff]  ;;  %v563_v29 = vmul.f32 %v523_v16, %v523_v16  ;;  %v526_v30 = vsub.f32 %v502_v20, %v514_v21  ;;  %v516_v33 = vld [vmem:[%s1309_s17 + $0x38] sm:$0xff]  ;;  %v517_v41 = vld [vmem:[%s1309_s17 + $0x40] sm:$0xff]  ;;  %v546_v9 = vadd.s32 80, %v1316_v5  ;;  %v547_v16 = vadd.s32 88, %v1316_v5 }
  0x23   : > { %v564_v31 = vmul.f32 %v524_v19, %v524_v19  ;;  %v573_v35 = vsel %vm549_vm2, %v561_v25, 0.0  ;;  %v527_v36 = vsub.f32 %v503_v26, %v515_v27  ;;  %v565_v37 = vmul.f32 %v525_v23, %v525_v23  ;;  %v506_v47 = vld [vmem:[%s1304_s14 + $0x48] sm:$0xff]  ;;  %v507_v56 = vld [vmem:[%s1304_s14 + $0x50] sm:$0xff]  ;;  %v508_v0 = vld [vmem:[%s1304_s14 + $0x58] sm:$0xff] }
  0x24   : > { %v574_v38 = vsel %vm550_vm3, %v562_v28, 0.0  ;;  %v575_v39 = vsel %vm551_vm4, %v563_v29, 0.0  ;;  %v528_v43 = vsub.f32 %v504_v32, %v516_v33  ;;  %v566_v44 = vmul.f32 %v526_v30, %v526_v30  ;;  %v518_v48 = vld [vmem:[%s1309_s17 + $0x48] sm:$0xff]  ;;  %v519_v57 = vld [vmem:[%s1309_s17 + $0x50] sm:$0xff]  ;;  %v520_v1 = vld [vmem:[%s1309_s17 + $0x58] sm:$0xff] }
  0x25   : > { %v576_v45 = vsel %vm552_vm5, %v564_v31, 0.0  ;;  %v587_v46 = vsel %vm483_vm0, %v573_v35, 0.0  ;;  %v588_v50 = vsel %vm483_vm0, %v574_v38, 0.0  ;;  %v590_v51 = vsel %vm483_vm0, %v575_v39, 0.0 }
  0x26   : > { %v529_v52 = vsub.f32 %v505_v40, %v517_v41  ;;  %v567_v53 = vmul.f32 %v527_v36, %v527_v36  ;;  %v577_v54 = vsel %vm553_vm6, %v565_v37, 0.0  ;;  %v589_v55 = vadd.f32 %v588_v50, %v587_v46 }
  0x27   : > { %v592_v59 = vsel %vm483_vm0, %v576_v45, 0.0  ;;  %v530_v60 = vsub.f32 %v506_v47, %v518_v48  ;;  %v568_v61 = vmul.f32 %v528_v43, %v528_v43  ;;  %v578_v62 = vsel %vm554_vm7, %v566_v44, 0.0 }
  0x28   : > { %v591_v63 = vadd.f32 %v590_v51, %v589_v55  ;;  %v594_v3 = vsel %vm483_vm0, %v577_v54, 0.0  ;;  %v531_v4 = vsub.f32 %v507_v56, %v519_v57  ;;  %v569_v6 = vmul.f32 %v529_v52, %v529_v52 }
  0x29   : > { %v579_v7 = vsel %vm555_vm8, %v567_v53, 0.0  ;;  %v596_v10 = vsel %vm483_vm0, %v578_v62, 0.0  ;;  %v532_v11 = vsub.f32 %v508_v0, %v520_v1  ;;  %v570_v13 = vmul.f32 %v530_v60, %v530_v60 }
  0x2a   : > { %v593_v8 = vadd.f32 %v592_v59, %v591_v63  ;;  %v580_v14 = vsel %vm556_vm9, %v568_v61, 0.0  ;;  %vm558_vm11 = vcmp.lt.s32.totalorder %v545_v2, %v1323_v12  ;;  %v598_v17 = vsel %vm483_vm0, %v579_v7, 0.0 }
  0x2b   : > { %v571_v18 = vmul.f32 %v531_v4, %v531_v4  ;;  %v581_v19 = vsel %vm557_vm10, %v569_v6, 0.0  ;;  %vm559_vm12 = vcmp.lt.s32.totalorder %v546_v9, %v1323_v12  ;;  %v600_v21 = vsel %vm483_vm0, %v580_v14, 0.0 }
  0x2c   : > { %v595_v15 = vadd.f32 %v594_v3, %v593_v8  ;;  %v572_v22 = vmul.f32 %v532_v11, %v532_v11  ;;  %v582_v23 = vsel %vm558_vm11, %v570_v13, 0.0  ;;  %vm560_vm13 = vcmp.lt.s32.totalorder %v547_v16, %v1323_v12 }
  0x2d   : > { %v602_v25 = vsel %vm483_vm0, %v581_v19, 0.0  ;;  %v583_v26 = vsel %vm559_vm12, %v571_v18, 0.0  ;;  %v604_v27 = vsel %vm483_vm0, %v582_v23, 0.0 }
  0x2e   : > { %v597_v20 = vadd.f32 %v596_v10, %v595_v15  ;;  %v584_v28 = vsel %vm560_vm13, %v572_v22, 0.0  ;;  %v606_v30 = vsel %vm483_vm0, %v583_v26, 0.0 }
  0x2f   : > { %v608_v32 = vsel %vm483_vm0, %v584_v28, 0.0 }
  0x30   : > { %v599_v24 = vadd.f32 %v598_v17, %v597_v20 }
  0x32   : > { %v601_v5 = vadd.f32 %v600_v21, %v599_v24 }
  0x34   : > { %v603_v29 = vadd.f32 %v602_v25, %v601_v5 }
  0x36   : > { %v605_v31 = vadd.f32 %v604_v27, %v603_v29 }
  0x38   : > { %v607_v33 = vadd.f32 %v606_v30, %v605_v31 }
  0x3a   : > { %v609_v35 = vadd.f32 %v608_v32, %v607_v33 }
  0x3c   : > { %v610_v36 = vadd.f32 %v609_v35, %v585_v34 }
  0x3e   : > { %611 = vst.msk [vmem:[#allocation2] sm:$0xff] %vm483_vm0, %v610_v36 }
  0x3f PF: > { %p612_p0 = scmp.eq.s32.totalorder %s1193_s21, 0 }
  0x40   : > { %v628_v12 = vld [vmem:[%s1592_s2] sm:$0xff] (%p612_p0)  ;;  %v629_v37 = vld [vmem:[%s1592_s2 + $0x8] sm:$0xff] (%p612_p0)  ;;  %v630_v38 = vld [vmem:[%s1592_s2 + $0x10] sm:$0xff] (%p612_p0)  ;;  %v619_v44 = vlaneseq (%p612_p0)  ;;  %vm718_vm14 = vcmask (%p612_p0), 261120  }
  0x41   : > { %616 = sbr.rel (!%p612_p0) target bundleno = 311 (0x137), region = 52  ;;  %v636_v39 = vld [vmem:[%s1593_s3] sm:$0xff] (%p612_p0)  ;;  %v631_v40 = vld [vmem:[%s1592_s2 + $0x18] sm:$0xff] (%p612_p0)  ;;  %v633_v42 = vld [vmem:[%s1592_s2 + $0x28] sm:$0xff] (%p612_p0)  ;;  %v1424_v53 = vmul.f32 (%p612_p0), %v628_v12, %v628_v12  ;;  %v1426_v54 = vmul.f32 (%p612_p0), %v629_v37, %v629_v37  ;;  %v1428_v55 = vmul.f32 (%p612_p0), %v630_v38, %v630_v38 }
  0x42   : > { %v632_v41 = vld [vmem:[%s1592_s2 + $0x20] sm:$0xff] (%p612_p0)  ;;  %v668_v43 = vmul.f32 (%p612_p0), 1.442695, %v636_v39  ;;  %v634_v45 = vld [vmem:[%s1592_s2 + $0x30] sm:$0xff] (%p612_p0)  ;;  %v635_v46 = vld [vmem:[%s1592_s2 + $0x38] sm:$0xff] (%p612_p0)  ;;  %v1433_v57 = vmul.f32 (%p612_p0), %v631_v40, %v631_v40  ;;  %v1437_v59 = vshrl.u32 (%p612_p0), %v619_v44, 7  ;;  %v1450_v63 = vmul.f32 (%p612_p0), %v633_v42, %v633_v42 }
  0x43   : > { %v637_v47 = vld [vmem:[%s1593_s3 + $0x8] sm:$0xff] (%p612_p0)  ;;  %v638_v48 = vld [vmem:[%s1593_s3 + $0x10] sm:$0xff] (%p612_p0)  ;;  %v639_v49 = vld [vmem:[%s1593_s3 + $0x18] sm:$0xff] (%p612_p0)  ;;  %v1435_v58 = vmul.f32 (%p612_p0), %v632_v41, %v632_v41  ;;  %v644_v4 = vadd.f32 (%p612_p0), 1.0, %v636_v39  ;;  %v1455_v6 = vmul.f32 (%p612_p0), %v634_v45, %v634_v45  ;;  %v1457_v7 = vmul.f32 (%p612_p0), %v635_v46, %v635_v46 }
  0x44   : > { %v640_v50 = vld [vmem:[%s1593_s3 + $0x20] sm:$0xff] (%p612_p0)  ;;  %v641_v51 = vld [vmem:[%s1593_s3 + $0x28] sm:$0xff] (%p612_p0)  ;;  %v642_v52 = vld [vmem:[%s1593_s3 + $0x30] sm:$0xff] (%p612_p0)  ;;  %1109 = vpow2.f32 (%p612_p0), %v668_v43  ;;  %v670_v0 = vmul.f32 (%p612_p0), 1.442695, %v637_v47  ;;  %v1469_v11 = vadd.f32 (%p612_p0), 1.0, %v637_v47 }
  0x45   : > { %v748_v56 = vld [vmem:[%s1594_s4 + $0x8] sm:$0xff] (%p612_p0)  ;;  %v749_v60 = vld [vmem:[%s1594_s4 + $0x10] sm:$0xff] (%p612_p0)  ;;  %v750_v61 = vld [vmem:[%s1594_s4 + $0x18] sm:$0xff] (%p612_p0)  ;;  %v672_v1 = vmul.f32 (%p612_p0), 1.442695, %v638_v48  ;;  %v646_v22 = vadd.f32 (%p612_p0), 1.0, %v638_v48  ;;  %v660_v27 = vsub.f32 (%p612_p0), %v644_v4, %v1424_v53 }
  0x46   : > { %v1448_v62 = vld [vmem:[%s1594_s4 + $0x38] sm:$0xff]  ;;  %v674_v2 = vmul.f32 1.442695, %v639_v49  ;;  %v676_v8 = vmul.f32 1.442695, %v640_v50  ;;  %v1462_v9 = vld [vmem:[%s1594_s4] sm:$0xff]  ;;  %1111 = vpow2.f32 %v670_v0  ;;  %v661_v41 = vsub.f32 %v1469_v11, %v1426_v54 }
  0x47   : > { %v643_v3 = vld [vmem:[%s1593_s3 + $0x38] sm:$0xff]  ;;  %v1467_v10 = vld [vmem:[%s1594_s4 + $0x20] sm:$0xff]  ;;  %v678_v13 = vmul.f32 1.442695, %v641_v51  ;;  %v680_v14 = vmul.f32 1.442695, %v642_v52  ;;  %1113 = vpow2.f32 %v672_v1  ;;  %v662_v45 = vsub.f32 %v646_v22, %v1428_v55 }
  0x48   : > { %v1474_v15 = vld [vmem:[%s1594_s4 + $0x28] sm:$0xff]  ;;  %v756_v16 = vrot.slane %v748_v56, 1  ;;  %v757_v17 = vrot.slane %v749_v60, 1  ;;  %v758_v18 = vrot.slane %v750_v61, 1  ;;  %1115 = vpow2.f32 %v674_v2  ;;  %v1481_v23 = vld [vmem:[%s1594_s4 + $0x30] sm:$0xff] }
  0x49   : > { %v682_v19 = vmul.f32 1.442695, %v643_v3  ;;  %v755_v20 = vrot.slane %v1462_v9, 1  ;;  %v759_v21 = vrot.slane %v1467_v10, 1  ;;  %1117 = vpow2.f32 %v676_v8 }
  0x4a   : > { %v760_v24 = vrot.slane %v1474_v15, 1  ;;  %vm763_vm15 = vcmp.lt.s32.totalorder %v1437_v59, 7  ;;  %v647_v25 = vadd.f32 1.0, %v639_v49  ;;  %v648_v26 = vadd.f32 1.0, %v640_v50 }
  0x4b   : > { %1119 = vpow2.f32 %v678_v13  ;;  %v767_v5 = vsel %vm763_vm15, %v758_v18, %v759_v21  ;;  %v768_v28 = vsel %vm763_vm15, %v757_v17, %v758_v18  ;;  %v769_v29 = vsel %vm763_vm15, %v756_v16, %v757_v17 }
  0x4c   : > { %1121 = vpow2.f32 %v680_v14  ;;  %v761_v30 = vrot.slane %v1481_v23, 1  ;;  %v770_v31 = vsel %vm763_vm15, %v755_v20, %v756_v16  ;;  %v783_v32 = vsub.f32 %v769_v29, %v748_v56 }
  0x4d   : > { %1123 = vpow2.f32 %v682_v19  ;;  %v766_v33 = vsel %vm763_vm15, %v759_v21, %v760_v24  ;;  %v782_v34 = vsub.f32 %v770_v31, %v1462_v9  ;;  %v784_v35 = vsub.f32 %v768_v28, %v749_v60 }
  0x4e   : > { %v785_v36 = vsub.f32 %v767_v5, %v750_v61  ;;  %v649_v12 = vadd.f32 1.0, %v641_v51  ;;  %v650_v37 = vadd.f32 1.0, %v642_v52  ;;  %v762_v38 = vrot.slane %v1448_v62, 1 }
  0x4f   : > { %v791_v39 = vand.u32 2147483647, %v783_v32  ;;  %v651_v40 = vadd.f32 1.0, %v643_v3  ;;  %v790_v42 = vand.u32 2147483647, %v782_v34  ;;  %v765_v46 = vsel %vm763_vm15, %v760_v24, %v761_v30 }
  0x50   : > { %v792_v43 = vand.u32 2147483647, %v784_v35  ;;  %v786_v47 = vsub.f32 %v766_v33, %v1467_v10  ;;  %v793_v48 = vand.u32 2147483647, %v785_v36  ;;  %v663_v49 = vsub.f32 %v647_v25, %v1433_v57 }
  0x51   : > { %v1110_v44 = vpop.eup %1109  ;;  %v821_v51 = vsel %vm718_vm14, %v790_v42, 0.0  ;;  %v822_v52 = vsel %vm718_vm14, %v791_v39, 0.0  ;;  %v664_v53 = vsub.f32 %v648_v26, %v1435_v58  ;;  %v764_v54 = vsel %vm763_vm15, %v761_v30, %v762_v38 }
  0x52   : > { %v684_v50 = vsub.f32 %v660_v27, %v1110_v44  ;;  %v823_v56 = vadd.f32 %v822_v52, %v821_v51  ;;  %v824_v55 = vsel %vm718_vm14, %v792_v43, 0.0  ;;  %v665_v61 = vsub.f32 %v649_v12, %v1450_v63 }
  0x53   : > { %v1112_v60 = vpop.eup %1111  ;;  %v771_v57 = vsel %vm763_vm15, %v762_v38, %v755_v20  ;;  %v787_v1 = vsub.f32 %v765_v46, %v1474_v15  ;;  %v794_v4 = vand.u32 2147483647, %v786_v47  ;;  %v826_v58 = vsel %vm718_vm14, %v793_v48, 0.0 }
  0x54   : > { %v692_v0 = vmul.f32 -0.5, %v684_v50  ;;  %v1114_v2 = vpop.eup %1113  ;;  %v685_v3 = vsub.f32 %v661_v41, %v1112_v60  ;;  %v825_v8 = vadd.f32 %v824_v55, %v823_v56  ;;  %v666_v10 = vsub.f32 %v650_v37, %v1455_v6 }
  0x55   : > { %v1116_v9 = vpop.eup %1115  ;;  %v667_v11 = vsub.f32 %v651_v40, %v1457_v7  ;;  %v686_v13 = vsub.f32 %v662_v45, %v1114_v2  ;;  %v788_v63 = vsub.f32 %v764_v54, %v1481_v23  ;;  %v789_v15 = vsub.f32 %v771_v57, %v1448_v62 }
  0x56   : > { %v1118_v14 = vpop.eup %1117  ;;  %v687_v16 = vsub.f32 %v663_v49, %v1116_v9  ;;  %v693_v17 = vmul.f32 -0.5, %v685_v3  ;;  %v719_v18 = vsel %vm718_vm14, %v692_v0, 0.0  ;;  %v795_v22 = vand.u32 2147483647, %v787_v1 }
  0x57   : > { %v688_v20 = vsub.f32 %v664_v53, %v1118_v14  ;;  %v694_v21 = vmul.f32 -0.5, %v686_v13  ;;  %v827_v24 = vadd.f32 %v826_v58, %v825_v8  ;;  %v828_v5 = vsel %vm718_vm14, %v794_v4, 0.0 }
  0x58   : > { %v1120_v19 = vpop.eup %1119  ;;  %v695_v6 = vmul.f32 -0.5, %v687_v16  ;;  %v720_v7 = vsel %vm718_vm14, %v693_v17, 0.0  ;;  %v627_v33 = vadd.s32 56, %v1437_v59  ;;  %v796_v37 = vand.u32 2147483647, %v788_v63 }
  0x59   : > { %v1122_v25 = vpop.eup %1121  ;;  %v689_v26 = vsub.f32 %v665_v61, %v1120_v19  ;;  %v696_v28 = vmul.f32 -0.5, %v688_v20  ;;  %v721_v29 = vadd.f32 %v720_v7, %v719_v18  ;;  %v722_v30 = vsel %vm718_vm14, %v694_v21, 0.0  ;;  %v820_v63 = vld [vmem:[#allocation4] sm:$0x1] }
  0x5a   : > { %v1124_v23 = vpop.eup %1123  ;;  %v690_v27 = vsub.f32 %v666_v10, %v1122_v25  ;;  %v724_v32 = vsel %vm718_vm14, %v695_v6, 0.0  ;;  %v829_v35 = vadd.f32 %v828_v5, %v827_v24  ;;  %v830_v38 = vsel %vm718_vm14, %v795_v22, 0.0  ;;  %v700_v10 = vld [vmem:[#allocation3] sm:$0x1] }
  0x5b   : > { %v691_v31 = vsub.f32 %v667_v11, %v1124_v23  ;;  %v697_v62 = vmul.f32 -0.5, %v689_v26  ;;  %v723_v34 = vadd.f32 %v722_v30, %v721_v29  ;;  %v726_v12 = vsel %vm718_vm14, %v696_v28, 0.0 }
  0x5c   : > { %v698_v36 = vmul.f32 -0.5, %v690_v27  ;;  %v797_v40 = vand.u32 2147483647, %v789_v15  ;;  %vm781_vm2 = vcmp.lt.s32.totalorder %v627_v33, 63  ;;  %v831_v44 = vadd.f32 %v830_v38, %v829_v35 }
  0x5d   : > { %v725_v39 = vadd.f32 %v724_v32, %v723_v34  ;;  %v699_v41 = vmul.f32 -0.5, %v691_v31  ;;  %v728_v42 = vsel %vm718_vm14, %v697_v62, 0.0  ;;  %v832_v59 = vsel %vm718_vm14, %v796_v37, 0.0 }
  0x5e   : > { %v730_v45 = vsel %vm718_vm14, %v698_v36, 0.0  ;;  %v805_v47 = vsel %vm781_vm2, %v797_v40, 0.0  ;;  %v833_v50 = vadd.f32 %v832_v59, %v831_v44 }
  0x5f   : > { %v727_v43 = vadd.f32 %v726_v12, %v725_v39  ;;  %v732_v48 = vsel %vm718_vm14, %v699_v41, 0.0  ;;  %v834_v51 = vsel %vm718_vm14, %v805_v47, 0.0 }
  0x60   : > { %v835_v53 = vadd.f32 %v834_v51, %v833_v50 }
  0x61   : > { %v729_v46 = vadd.f32 %v728_v42, %v727_v43 }
  0x63   : > { %v731_v49 = vadd.f32 %v730_v45, %v729_v46 }
  0x65   : > { %v733_v52 = vadd.f32 %v732_v48, %v731_v49 }
  0x67   : > { %734 = vadd.xlane.f32.xlu0 %v733_v52 }
  0x6b   : > { %836 = vadd.xlane.f32.xlu0 %v835_v53 }
  0xf0   : > { %v735_v54 = vpop.xlane.xlu0 %734 }
  0xf1   : > { %v736_v56 = vrot.slane %v735_v54, 4 }
  0xf3   : > { %v737_v55 = vadd.f32 %v736_v56, %v735_v54 }
  0xf4   : > { %v837_v60 = vpop.xlane.xlu0 %836 }
  0xf5   : > { %v738_v61 = vrot.slane %v737_v55, 2  ;;  %v838_v0 = vrot.slane %v837_v60, 4 }
  0xf7   : > { %v839_v57 = vadd.f32 %v838_v0, %v837_v60  ;;  %v739_v1 = vadd.f32 %v738_v61, %v737_v55 }
  0xf9   : > { %v840_v2 = vrot.slane %v839_v57, 2  ;;  %v740_v3 = vrot.slane %v739_v1, 1 }
  0xfb   : > { %v841_v4 = vadd.f32 %v840_v2, %v839_v57  ;;  %v741_v8 = vadd.f32 %v740_v3, %v739_v1 }
  0xfd   : > { %1043 = vpush %v741_v8  ;;  %v842_v58 = vrot.slane %v841_v4, 1 }
  0xff   : > { %v843_v9 = vadd.f32 %v842_v58, %v841_v4 }
 0x101   : > { %1045 = vpush %v843_v9 }
 0x12e   : > { %s1044_s29 = spop %1043 }
 0x12f   : > { %v743_v11 = vstv %s1044_s29 }
 0x130   : > { %v744_v13 = vadd.f32 %v743_v11, %v700_v10 }
 0x132   : > { %746 = vst.msk [vmem:[#allocation3] sm:$0x1] %vm485_vm1, %v744_v13  ;;  %s1046_s9 = spop %1045 }
 0x133   : > { %v848_v14 = vstv %s1046_s9 }
 0x134   : > { %v849_v16 = vadd.f32 %v848_v14, %v820_v63 }
 0x136   : > { %850 = vst.msk [vmem:[#allocation4] sm:$0x1] %vm485_vm1, %v849_v16 }
 0x137 PF: > { %v856_v17 = vld [vmem:[#allocation2] sm:$0xff]  ;;  %v877_v7 = vlaneseq  ;;  %s1038_s16 = sshll.u32 %s1193_s21, 7  ;;  %s909_s17 = sshll.u32 %s404_s24, 4  ;;  %s910_s17 = int_to_ptr.vmem [resolvable:$true] %s909_s17 }
 0x138   : > { %v858_v18 = vsel %vm483_vm0, %v856_v17, 0.0  ;;  %s1546_s29 = scalar_lea.hbm %s1595_s5, %s1038_s16  ;;  %s896_s9 = scalar_lea.sflag [#allocation7], %s402_s7 }
 0x139   : > { %859 = vadd.xlane.f32.xlu0 %v858_v18  ;;  %v869_v26 = vld [vmem:[#allocation3] sm:$0x1]  ;;  %v878_v5 = vshrl.u32 %v877_v7, 7  ;;  %v880_v23 = vand.u32 127, %v877_v7  ;;  %s1125_s21 = scalar_lea.vmem %s910_s17, 128 }
 0x13a   : > { %p1126_p1 = scmp.ne.s32.totalorder %s910_s17, %s1125_s21 }
 0x13b   : > { %vm881_vm0 = vcmp.eq.s32.totalorder %v878_v5, 0  ;;  %vm886_vm1 = vcmp.eq.s32.totalorder %v880_v23, 2  ;;  %vm884_vm3 = vcmp.eq.s32.totalorder %v880_v23, 1  ;;  %vm882_vm4 = vcmp.eq.s32.totalorder %v880_v23, 0 }
 0x13c   : > { %vm887_vm5 = vmand %vm881_vm0, %vm886_vm1  ;;  %p1127_p2 = pnand %p1126_p1, %p1275_p4 }
 0x13d   : > { %v873_v6 = vld [vmem:[#allocation4] sm:$0x1]  ;;  %vm885_vm6 = vmand %vm881_vm0, %vm884_vm3 }
 0x13e   : > { %vm883_vm7 = vmand %vm881_vm0, %vm882_vm4  ;;  %p1128_p3 = pneg %p1127_p2 }
 0x1c2   : > { %v860_v15 = vpop.xlane.xlu0 %859 }
 0x1c3   : > { %v861_v19 = vrot.slane %v860_v15, 4 }
 0x1c5   : > { %v862_v20 = vadd.f32 %v861_v19, %v860_v15 }
 0x1c7   : > { %v863_v21 = vrot.slane %v862_v20, 2 }
 0x1c9   : > { %v864_v22 = vadd.f32 %v863_v21, %v862_v20 }
 0x1cb   : > { %v865_v24 = vrot.slane %v864_v22, 1 }
 0x1cd   : > { %v866_v25 = vadd.f32 %v865_v24, %v864_v22 }
 0x1cf   : > { %1047 = vpush %v866_v25 }
 0x1d0   : > { %1049 = vpush %v869_v26 }
 0x1d1   : > { %1051 = vpush %v873_v6 }
 0x200   : > { %s1048_s10 = spop %1047 }
 0x201   : > { %s868_s11 = smul.f32 0.0006510417, %s1048_s10  ;;  %s1050_s12 = spop %1049 }
 0x202   : > { %s872_s13 = smul.f32 0.015625, %s1050_s12  ;;  %s1052_s14 = spop %1051 }
 0x203   : > { %s876_s15 = smul.f32 0.0004960318, %s1052_s14  ;;  %v892_v30 = vstv %s868_s11  ;;  %s1204_s10 = smov [#allocation6]  }
 0x204   : > { %v890_v27 = vstv %s872_s13  ;;  %s1129_s12 = sshll.u32 %s1204_s10, 4  ;;  %s1130_s12 = int_to_ptr.vmem [resolvable:$false] %s1129_s12 }
 0x205   : > { %v888_v28 = vstv %s876_s15  ;;  %s1131_s11 = scalar_lea.vmem %s1130_s12, 256  ;;  %p1132_p5 = scmp.lt.s32.totalorder %s910_s17, %s1130_s12 }
 0x206   : > { %v889_v29 = vsel %vm887_vm5, %v888_v28, 0.0  ;;  %p1133_p6 = scmp.lt.s32.totalorder %s1131_s11, %s1125_s21 }
 0x207   : > { %v891_v31 = vsel %vm885_vm6, %v890_v27, %v889_v29 }
 0x208   : > { %v893_v62 = vsel %vm883_vm7, %v892_v30, %v891_v31  ;;  %p1134_p7 = por %p1133_p6, %p1132_p5 }
 0x209   : > { %894 = vst [vmem:[%s404_s24] sm:$0xff] %v893_v62 }
 0x20a   : > { %p1135_p9 = pnand %p1134_p7, %p1128_p3 }
 0x20c   : > { %1138 = shalt.err (!%p1135_p9)
}
 0x20d   : > { %s1139_s8 = scalar_lea.hbm %s1546_s29, 128  ;;  %s1143_s13 = scalar_lea.hbm %s1595_s5, 256 }
 0x20e   : > { %p1140_p10 = scmp.ne.s32.totalorder %s1546_s29, %s1139_s8  ;;  %p1144_p13 = scmp.lt.s32.totalorder %s1546_s29, %s1595_s5 }
 0x20f   : > { %p1145_p0 = scmp.lt.s32.totalorder %s1143_s13, %s1139_s8 }
 0x210   : > { %p1141_p11 = pnand %p1140_p10, %p1275_p4 }
 0x211   : > { %p1146_p1 = por %p1145_p0, %p1144_p13 }
 0x212   : > { %p1142_p12 = pneg %p1141_p11 }
 0x214   : > { %p1147_p2 = pnand %p1146_p1, %p1142_p12 }
 0x216   : > { %1150 = shalt.err (!%p1147_p2)
}
 0x217   : > { %1053 = dma.vmem_to_hbm [thread:$0]  (%p1275_p4), %s910_s17, 128, %s1546_s29, %s896_s9  }
 0x218 PF: > { %p1059_p3 = scmp.ge.s32.totalorder %s1201_s23, 2  ;;  %s921_s16 = sand.u32 1, %s1181_s18  }
 0x219   : > { %s922_s25 = scalar_lea.sflag [#allocation7], %s921_s16 }
 0x21a   : > { %p1056_p5 = pnand %p1059_p3, %p1282_p8 }
 0x21c   : > { %p1057_p6 = pneg %p1056_p5 }
 0x21e   : > { %1176 = dma.done.wait (%p1057_p6), %s922_s25, 128  }
 0x21f   : > { %1178 = vsyncadd (%p1057_p6), %s922_s25, 4294967168  ;;  %s18_s23 = sadd.s32 1, %s1201_s23   ;;  %s1598_s18 = smov %s1185_s19 }
 0x220   : > { %p15_p7 = scmp.ge.s32.totalorder %s18_s23, 4   ;;  %s1599_s19 = smov %s1189_s20 }
 0x221   : > { %s1600_s20 = smov %s1288_s6  ;;  %s1601_s21 = smov %s1197_s22 }
 0x222   : > { %s1602_s22 = smov %s1604_s26  ;;  %17 = sbr.rel (!%p15_p7) target bundleno = 4 (0x4), region = 103 }
 0x227   :  { %927 = vsyncpa [#allocation7], 1 }
 0x228   :  { %929 = vsyncpa [#allocation7 + $0x1], 1 }

</bundles_post_ra>
